<compile_context>
chip_gen: v6e
topology: v6e:2x2x1
jax: 0.10.0
libtpu: 0.0.40
codegen_flags: <defaults>
</compile_context>

<pallas_src>
import functools
import math

import jax
import jax.numpy as jnp
from jax.experimental import pallas as pl
from jax.experimental.pallas import tpu as pltpu

_MIB = 1024 * 1024
_LANE_TILE_CAP = 8192          # max lanes resident per block (64 unrolled 128-lane chunks)


def _round_up(a, b):
    return (a + b - 1) // b * b


# --------------------------------------------------------------------------- #
# In-kernel helpers
# --------------------------------------------------------------------------- #
def _powp(v, p, eps, static_p):
    """clamp(v, eps) ** p in f32.  Integer p -> VPU multiplies (no EUP)."""
    v = jnp.maximum(v.astype(jnp.float32), eps)
    if static_p is not None:
        r = v
        for _ in range(static_p - 1):
            r = r * v
        return r
    return jnp.exp(p * jnp.log(v))


def _gem_reduce_kernel(p_ref, x_ref, o_ref, *scratch,
                       eps, hw, tile_hw, log_hw, static_p):
    """Ungrouped GeM: rows (N*C) on sublanes, (a tile of) H*W on lanes.

    Single-k  (tile_hw == hw) : reduce the whole row and write output directly.
    Multi-k   (hw split)      : chunked VALU adds into a (rows, 128) f32
                                accumulator; XLU reduce + store only at the end.
    """
    p = p_ref[0]
    rows = x_ref.shape[0]
    n_full = tile_hw // 128
    tail = tile_hw % 128
    multi_k = len(scratch) > 0

    def finalize(total):
        # mean**(1/p) == exp((log(sum) - log(H*W)) / p)
        o_ref[...] = jnp.exp((jnp.log(total) - log_hw) / p).astype(o_ref.dtype)

    if not multi_k:
        # Whole H*W resident in lanes (full-extent block): one-shot reduce.
        if n_full >= 1:
            s = _powp(x_ref[:, 0:128], p, eps, static_p)
            for c in range(1, n_full):
                s = s + _powp(x_ref[:, c * 128:(c + 1) * 128], p, eps, static_p)
            total = jnp.sum(s, axis=-1, keepdims=True)
            if tail:
                total = total + jnp.sum(
                    _powp(x_ref[:, n_full * 128:tile_hw], p, eps, static_p),
                    axis=-1, keepdims=True)
        else:
            total = jnp.sum(_powp(x_ref[...], p, eps, static_p),
                            axis=-1, keepdims=True)
        finalize(total)
    else:
        acc_ref = scratch[0]                      # (rows, 128) f32, lane-dense
        k = pl.program_id(1)
        need_mask = (hw % tile_hw) != 0           # static

        @pl.when(k == 0)
        def _init():
            acc_ref[...] = jnp.zeros_like(acc_ref)

        def chunk(c):
            v = _powp(x_ref[:, c * 128:(c + 1) * 128], p, eps, static_p)
            if need_mask:
                lane = jax.lax.broadcasted_iota(jnp.int32, (rows, 128), 1)
                v = jnp.where(k * tile_hw + c * 128 + lane < hw, v, 0.0)
            return v

        s = chunk(0)
        for c in range(1, n_full):                # tile_hw is a multiple of 128
            s = s + chunk(c)
        acc_ref[...] += s

        @pl.when(k == pl.num_programs(1) - 1)
        def _fin():
            finalize(jnp.sum(acc_ref[...], axis=-1, keepdims=True))


def _gem_grouped_kernel(p_ref, x_ref, ones_ref, o_ref, *,
                        eps, log_hw, static_p):
    """Lane-packed GeM: each row holds g channels' spatial maps back-to-back.

    Per-group sums via a block-diagonal ones matmul on the idle MXU:
      (rows, g*hw) @ (g*hw, g) -> (rows, g)
    """
    p = p_ref[0]
    xp = _powp(x_ref[...], p, eps, static_p)                       # (rows, g*hw) f32
    s = jnp.dot(xp, ones_ref[...], preferred_element_type=jnp.float32)
    o_ref[...] = jnp.exp((jnp.log(s) - log_hw) / p).astype(o_ref.dtype)


# --------------------------------------------------------------------------- #
# Wrapper-side tiling decisions
# --------------------------------------------------------------------------- #
def _vmem_budget():
    """Return (target_block_budget_bytes, vmem_limit_bytes_or_None)."""
    phys = None
    try:
        info = pltpu.get_tpu_info()
        phys = getattr(info, "vmem_capacity_bytes", None)
        phys = int(phys) if phys else None
    except Exception:
        phys = None
    if phys is None or phys <= 0:
        # Unknown generation: stay inside the smallest default scoped VMEM (16 MiB, v5e).
        return 12 * _MIB, None
    # Raise the scoped limit to half of physical, capped at 64 MiB:
    #   v5e/v6e (128 MiB physical) -> 64 MiB, v7x (64 MiB physical) -> 32 MiB.
    limit = min(64 * _MIB, phys // 2)
    return (limit * 3) // 4, limit


def _choose_group(nc, hw):
    """Pick g>1 channels-per-row when H*W is small and lane-unfriendly."""
    if hw % 128 == 0 or hw > 2048:
        return 1
    for g in range(32, 1, -1):          # g<=32 keeps the ones-matmul cheap on v5e
        if nc % g == 0 and nc // g >= 8 and g * hw <= _LANE_TILE_CAP:
            return g
    return 1


def _choose_reduce_tiles(nc, hw, itemsize, target_bytes):
    """(tile_nc, tile_hw) for the ungrouped path, layout-aware."""
    tile_hw = hw if hw <= _LANE_TILE_CAP else _LANE_TILE_CAP
    lanes_pad = _round_up(tile_hw, 128)
    # Per 8-row slab: double-buffered input + one f32 working copy + the
    # (rows, 128) f32 partial/accumulator slab.
    slab = 8 * (lanes_pad * (2 * itemsize + 4) + 128 * 4)
    rows = max(8, (target_bytes // slab) * 8)
    if rows >= nc:
        rows = nc                         # full-extent row block is always legal
    return rows, tile_hw


def _choose_grouped_rows(nc_g, L, g, itemsize, target_bytes):
    """Row tile for the lane-packed path, layout-aware."""
    lanes_pad = _round_up(L, 128)
    g_pad = _round_up(g, 128)
    target = max(_MIB, target_bytes - 2 * L * g_pad * 4)   # resident ones matrix
    # Per 8-row slab: double-buffered input + f32 x**p copy + output block.
    slab = 8 * (lanes_pad * (2 * itemsize + 4) + 2 * g_pad * 4)
    rows = max(8, (target // slab) * 8)
    if rows >= nc_g:
        rows = nc_g
    return rows


def _static_int_p(p):
    """If p is concretely a small integer, return it (enables VPU pow)."""
    try:
        pv = float(jax.device_get(p).reshape(-1)[0])
        if pv.is_integer() and 1.0 <= pv <= 8.0:
            return int(pv)
    except Exception:
        pass
    return None


# --------------------------------------------------------------------------- #
# Public entry point
# --------------------------------------------------------------------------- #
def gem_pallas(x, p, eps=1e-6):
    """x: (N, C, H, W) float, p: (1,) float32 -> (N, C, 1, 1) float32."""
    N, C, H, W = x.shape
    nc, hw = N * C, H * W
    p = jnp.asarray(p, jnp.float32).reshape((1,))
    itemsize = jnp.dtype(x.dtype).itemsize
    log_hw = math.log(float(hw))
    target_bytes, vmem_limit = _vmem_budget()
    static_p = _static_int_p(p)

    g = _choose_group(nc, hw)

    if g > 1:
        # ---- lane-packed path: g channels per row, group-sum on the MXU ---- #
        nc_g, L = nc // g, g * hw
        x2d = x.reshape(nc_g, L)                       # free (contiguous) reshape
        lane = jnp.arange(L, dtype=jnp.int32)[:, None]
        grp = jnp.arange(g, dtype=jnp.int32)[None, :]
        ones = (lane // hw == grp).astype(jnp.float32)  # (L, g) block-diagonal ones

        tile_rows = _choose_grouped_rows(nc_g, L, g, itemsize, target_bytes)
        grid = (pl.cdiv(nc_g, tile_rows),)
        kernel = functools.partial(_gem_grouped_kernel, eps=eps, log_hw=log_hw,
                                   static_p=static_p)
        out = pl.pallas_call(
            kernel,
            out_shape=jax.ShapeDtypeStruct((nc_g, g), jnp.float32),
            grid=grid,
            in_specs=[
                pl.BlockSpec(memory_space=pltpu.SMEM),                # p
                pl.BlockSpec((tile_rows, L), lambda i: (i, 0)),       # x rows
                pl.BlockSpec((L, g), lambda i: (0, 0)),               # ones (resident)
            ],
            out_specs=pl.BlockSpec((tile_rows, g), lambda i: (i, 0)),
            compiler_params=pltpu.CompilerParams(
                dimension_semantics=("parallel",),
                vmem_limit_bytes=vmem_limit),
        )(p, x2d, ones)
        return out.reshape(N, C, 1, 1)

    # ---- ungrouped path: rows on sublanes, H*W on lanes (split if huge) ---- #
    x2d = x.reshape(nc, hw)
    tile_nc, tile_hw = _choose_reduce_tiles(nc, hw, itemsize, target_bytes)
    n_k = pl.cdiv(hw, tile_hw)
    grid = (pl.cdiv(nc, tile_nc), n_k)
    multi_k = n_k > 1
    scratch = [pltpu.VMEM((tile_nc, 128), jnp.float32)] if multi_k else []

    kernel = functools.partial(_gem_reduce_kernel, eps=eps, hw=hw,
                               tile_hw=tile_hw, log_hw=log_hw, static_p=static_p)
    out = pl.pallas_call(
        kernel,
        out_shape=jax.ShapeDtypeStruct((nc, 1), jnp.float32),
        grid=grid,
        in_specs=[
            pl.BlockSpec(memory_space=pltpu.SMEM),                    # p
            pl.BlockSpec((tile_nc, tile_hw), lambda i, k: (i, k)),    # x tile
        ],
        out_specs=pl.BlockSpec((tile_nc, 1), lambda i, k: (i, 0)),    # resident over k
        scratch_shapes=scratch,
        compiler_params=pltpu.CompilerParams(
            dimension_semantics=("parallel", "arbitrary"),
            vmem_limit_bytes=vmem_limit),
    )(p, x2d)
    return out.reshape(N, C, 1, 1)


def gem_reference(x, p, eps=1e-6):
    xc = jnp.maximum(x.astype(jnp.float32), eps)
    xp = xc ** p[0]
    mean = jnp.mean(xp, axis=(-2, -1), keepdims=True)
    return mean ** (1.0 / p[0])


if __name__ == "__main__":
    key = jax.random.PRNGKey(0)

    # Deterministic parameter init (matches nn.Parameter(torch.ones(1) * 3)).
    p = jnp.ones((1,), dtype=jnp.float32) * 3.0
    eps = 1e-6

    # Primary small-shape test (ungrouped path).
    N, C, H, W = 2, 4, 16, 16
    x = jax.random.normal(key, (N, C, H, W), dtype=jnp.float32)
    out = gem_pallas(x, p, eps)
    jax.block_until_ready(out)
    ref = gem_reference(x, p, eps)
    assert out.shape == (N, C, 1, 1)
    assert jnp.allclose(out, ref, rtol=1e-4, atol=1e-6)

    # Canonical small-H*W GeM head (7x7 feature map) exercising the lane-packed path.
    x2 = jax.random.normal(jax.random.PRNGKey(1), (2, 256, 7, 7), dtype=jnp.float32)
    out2 = gem_pallas(x2, p, eps)
    jax.block_until_ready(out2)
    ref2 = gem_reference(x2, p, eps)
    assert out2.shape == (2, 256, 1, 1)
    assert jnp.allclose(out2, ref2, rtol=1e-4, atol=1e-6)

    print("KERNEL_OK")
</pallas_src>

<mosaic_0001>
module attributes {stable_mosaic.version = 11 : i64} {
  func.func @_gem_reduce_kernel(%arg0: i32, %arg1: i32, %arg2: memref<1xf32, #tpu.memory_space<smem>>, %arg3: memref<8x256xf32, #tpu.memory_space<vmem>>, %arg4: memref<8x1xf32, #tpu.memory_space<vmem>>) attributes {dimension_semantics = [#tpu.dimension_semantics<parallel>, #tpu.dimension_semantics<arbitrary>], iteration_bounds = array<i64: 1, 1>, scalar_prefetch = 0 : i64, scratch_operands = 0 : i64, tpu.core_type = #tpu.core_type<tc>, window_params = [{transform_indices = @transform_0, window_bounds = array<i64: 1>}, {transform_indices = @transform_1, window_bounds = array<i64: 8, 256>}, {transform_indices = @transform_2, window_bounds = array<i64: 8, 1>}]} {
    %c0 = arith.constant 0 : index
    %0 = memref.load %arg2[%c0] : memref<1xf32, #tpu.memory_space<smem>>
    %c0_0 = arith.constant 0 : index
    %c0_1 = arith.constant 0 : index
    %1 = vector.load %arg3[%c0_0, %c0_1] : memref<8x256xf32, #tpu.memory_space<vmem>>, vector<8x128xf32>
    %cst = arith.constant 9.99999997E-7 : f32
    %2 = vector.broadcast %cst : f32 to vector<8x128xf32>
    %3 = arith.maximumf %1, %2 : vector<8x128xf32>
    %4 = arith.mulf %3, %3 : vector<8x128xf32>
    %5 = arith.mulf %4, %3 : vector<8x128xf32>
    %c0_2 = arith.constant 0 : index
    %c128 = arith.constant 128 : index
    %6 = vector.load %arg3[%c0_2, %c128] : memref<8x256xf32, #tpu.memory_space<vmem>>, vector<8x128xf32>
    %cst_3 = arith.constant 9.99999997E-7 : f32
    %7 = vector.broadcast %cst_3 : f32 to vector<8x128xf32>
    %8 = arith.maximumf %6, %7 : vector<8x128xf32>
    %9 = arith.mulf %8, %8 : vector<8x128xf32>
    %10 = arith.mulf %9, %8 : vector<8x128xf32>
    %11 = arith.addf %5, %10 : vector<8x128xf32>
    %cst_4 = arith.constant dense<0.000000e+00> : vector<8xf32>
    %12 = vector.multi_reduction <add>, %11, %cst_4 [1] : vector<8x128xf32> to vector<8xf32>
    %13 = vector.shape_cast %12 : vector<8xf32> to vector<8x1xf32>
    %14 = math.log %13 : vector<8x1xf32>
    %cst_5 = arith.constant 5.54517746 : f32
    %15 = vector.broadcast %cst_5 : f32 to vector<8x1xf32>
    %16 = arith.subf %14, %15 : vector<8x1xf32>
    %17 = vector.broadcast %0 : f32 to vector<8x1xf32>
    %18 = arith.divf %16, %17 : vector<8x1xf32>
    %19 = math.exp %18 : vector<8x1xf32>
    %c0_6 = arith.constant 0 : index
    %c0_7 = arith.constant 0 : index
    %20 = vector.load %arg4[%c0_6, %c0_7] : memref<8x1xf32, #tpu.memory_space<vmem>>, vector<8x1xf32>
    tpu.vector_store %arg4[%c0_6, %c0_7], %19 {strides = array<i32>} : memref<8x1xf32, #tpu.memory_space<vmem>>, vector<8x1xf32>,
    return
  }
  func.func @transform_0(%arg0: i32, %arg1: i32) -> i32 {
    %c0_i32 = arith.constant 0 : i32
    %c0_i32_0 = arith.constant 0 : i32
    return %c0_i32 : i32
  }
  func.func @transform_1(%arg0: i32, %arg1: i32) -> (i32, i32) {
    %c0_i32 = arith.constant 0 : i32
    return %arg0, %arg1 : i32, i32
  }
  func.func @transform_2(%arg0: i32, %arg1: i32) -> (i32, i32) {
    %c0_i32 = arith.constant 0 : i32
    %c0_i32_0 = arith.constant 0 : i32
    return %arg0, %c0_i32 : i32, i32
  }
}

</mosaic_0001>

<bundles_post_ra>
// kernel: tpu_custom_call.1
= control target key start
LH: loop header
LB: loop body
LE: loop exit
PB: predicated region body
PF: predicated region fallthrough
CT: control target
= control target key end

     0   :  { %8 = vsyncpa [#allocation4], 0  ;;  %s81_s9 = smov [#allocation3]   ;;  %s106_s0 = inlined_call_operand.<no memory space> [shape: f32[1], index: 0, kind: input, shape index: {}]   ;;  %s107_s1 = inlined_call_operand.hbm [shape: f32[8,256], index: 1, kind: input, shape index: {}]   ;;  %s108_s2 = inlined_call_operand.vmem [shape: f32[8,1], index: 2, kind: output, shape index: {}]  }
   0x1   :  { %s17_s10 = sshll.u32 %s81_s9, 4  ;;  %s18_s10 = int_to_ptr.vmem [resolvable:$true] %s17_s10 }
   0x2   :  { %s67_s11 = scalar_lea.vmem %s18_s10, 256  ;;  %p72_p1 = scmp.lt.s32.totalorder %s18_s10, %s18_s10 }
   0x3   :  { %p68_p0 = scmp.ne.s32.totalorder %s18_s10, %s67_s11  ;;  %p73_p2 = scmp.lt.s32.totalorder %s67_s11, %s67_s11 }
   0x5   :  { %p74_p3 = por %p73_p2, %p72_p1 }
   0x7   :  { %p75_p4 = pnand %p74_p3, %p68_p0 }
   0x9   :  { %78 = shalt.err (!%p75_p4)
}
   0xa   :  { %20 = dma.hbm_to_vmem [thread:$0]  %s107_s1, 256, %s18_s10, [#allocation4]  }
   0xb   :  { %79 = dma.done.wait [#allocation4], 256  }
   0xc   :  { %80 = vsyncadd [#allocation4], 4294967040  ;;  %v25_v0 = vld [vmem:[#allocation3] sm:$0xff]  ;;  %v29_v1 = vld [vmem:[#allocation3 + $0x8] sm:$0xff]  ;;  %v39_v10 = vstv %s106_s0  ;;  %vm44_vm0 = vcmask 7168  }
   0xd   :  { %v26_v2 = vmax.f32 %v25_v0, 1e-06  ;;  %v30_v3 = vmax.f32 %v29_v1, 1e-06 }
   0xf   :  { %v27_v4 = vmul.f32 %v26_v2, %v26_v2  ;;  %v31_v5 = vmul.f32 %v30_v3, %v30_v3 }
  0x11   :  { %v28_v6 = vmul.f32 %v27_v4, %v26_v2  ;;  %v32_v7 = vmul.f32 %v31_v5, %v30_v3 }
  0x13   :  { %v33_v8 = vadd.f32 %v32_v7, %v28_v6 }
  0x15   :  { %34 = vadd.xlane.f32.xlu0 %v33_v8 }
  0x9e   :  { %v35_v9 = vpop.xlane.xlu0 %34 }
  0x9f   :  { %53 = vlog2.f32 %v35_v9 }
  0xa0   :  { %55 = vrcp.f32 %v39_v10 }
  0xac   :  { %v54_v11 = vpop.eup %53 }
  0xad   :  { %v37_v12 = vmul.f32 0.6931472, %v54_v11  ;;  %v56_v13 = vpop.eup %55 }
  0xaf   :  { %v51_v14 = vadd.f32 -5.5451775, %v37_v12 }
  0xb1   :  { %v41_v15 = vmul.f32 %v56_v13, %v51_v14 }
  0xb3   :  { %v42_v16 = vmul.f32 1.442695, %v41_v15 }
  0xb5   :  { %57 = vpow2.f32 %v42_v16 }
  0xc2   :  { %v58_v17 = vpop.eup %57 }
  0xc3   :  { %45 = vst.msk [vmem:[%s108_s2] sm:$0xff] %vm44_vm0, %v58_v17 }
  0xc4   :  { %50 = vsyncpa [#allocation4], 1 }

</bundles_post_ra>
